<compile_context>
chip_gen: v7x
topology: tpu7x:2x2x1
jax: 0.10.0
libtpu: 0.0.40
codegen_flags: <defaults>
</compile_context>

<pallas_src>
import jax
import jax.numpy as jnp
from jax.experimental import pallas as pl
from jax.experimental.pallas import tpu as pltpu

BN_EPS = 1e-5


def _model_kernel(s_ref, pw_ref, o_ref):
    # s_ref : SMEM (8,) f32  -- [bias0, bias1, gamma0, gamma1, beta0, beta1, 0, 0]
    # pw_ref: VMEM (16, 27) f32 -- rows 0-7: im2col patches (4 pixels) tiled x2,
    #                              rows 8-15: conv weights (w0 x4 rows, w1 x4 rows)
    # o_ref : VMEM (1, 1) f32 -- pooled scalar output.
    pw = pw_ref[...]                                   # (16, 27)

    # ---- Conv2d for both live channels in ONE VPU multiply + ONE lane reduce.
    # Row i (i in 0..3)  -> channel 0, output pixel i
    # Row i (i in 4..7)  -> channel 1, output pixel i-4
    prod = pw[0:8, :] * pw[8:16, :]                    # (8, 27)
    conv = jnp.sum(prod, axis=-1, keepdims=True)       # (8, 1)

    pooled = jnp.zeros((), jnp.float32)
    for c in range(2):                                 # channel 2 is dead code
        # ---- bias + ReLU ----
        y = jnp.maximum(conv[4 * c:4 * c + 4, :] + s_ref[c], 0.0)   # (4, 1)
        # ---- BatchNorm2d, training mode (batch stats over N,H,W; N=1) ----
        m = jnp.mean(y)
        v = jnp.mean((y - m) ** 2)                     # biased variance
        y_bn = (y - m) * jax.lax.rsqrt(v + BN_EPS) * s_ref[2 + c] + s_ref[4 + c]
        # ---- AvgPool3d contribution: sum this channel's 2x2 window ----
        pooled = pooled + jnp.sum(y_bn)

    # Mean of the 8 pooled values (channels {0,1} x 2 x 2).
    o_ref[...] = jnp.reshape(pooled * 0.125, (1, 1))


@jax.jit
def model_forward(x_nchw, w, b, gamma, beta):
    """x_nchw: (1, 3, 4, 4) f32. Returns (1, 1, 1, 1) f32 (as PyTorch does)."""
    x = x_nchw[0].astype(jnp.float32)                        # (3, 4, 4)

    # Layout plumbing (pure slices / replication, no arithmetic), fused by XLA
    # into a single tiny producer for the packed VMEM slab.
    # im2col patch matrix: one row per output pixel, 27 taps (ic, kh, kw).
    patches = jnp.stack(
        [x[:, oh:oh + 3, ow:ow + 3].reshape(-1)
         for oh in range(2) for ow in range(2)],
        axis=0).astype(jnp.float32)                          # (4, 27)
    p8 = jnp.concatenate([patches, patches], axis=0)         # (8, 27)

    # Dead-channel elimination: only output channels 0 and 1 are consumed.
    w2 = w[:2].reshape(2, 27).astype(jnp.float32)            # (2, 27)
    w8 = jnp.repeat(w2, 4, axis=0)                           # (8, 27)
    pw = jnp.concatenate([p8, w8], axis=0)                   # (16, 27) VMEM slab

    # Packed scalar vector for SMEM: [b0, b1, g0, g1, be0, be1, 0, 0].
    scal = jnp.concatenate(
        [b[:2].astype(jnp.float32),
         gamma[:2].astype(jnp.float32),
         beta[:2].astype(jnp.float32),
         jnp.zeros((2,), jnp.float32)], axis=0)              # (8,)

    smem = pl.BlockSpec(memory_space=pltpu.MemorySpace.SMEM)
    vmem = pl.BlockSpec(memory_space=pltpu.MemorySpace.VMEM)

    out = pl.pallas_call(
        _model_kernel,
        out_shape=jax.ShapeDtypeStruct((1, 1), jnp.float32),
        in_specs=[smem, vmem],
        out_specs=vmem,
        cost_estimate=pl.CostEstimate(
            flops=520, transcendentals=2, bytes_accessed=1768),
    )(scal, pw)
    return out.reshape(1, 1, 1, 1)


def _reference(x, w, b, gamma, beta):
    """Pure-JAX reference mirroring the PyTorch forward (training-mode BN)."""
    y = jax.lax.conv_general_dilated(
        x, w, window_strides=(1, 1), padding="VALID",
        dimension_numbers=("NCHW", "OIHW", "NCHW"),
    ) + b[None, :, None, None]
    y = jnp.maximum(y, 0.0)
    mean = jnp.mean(y, axis=(0, 2, 3), keepdims=True)
    var = jnp.mean((y - mean) ** 2, axis=(0, 2, 3), keepdims=True)
    y = (y - mean) * jax.lax.rsqrt(var + BN_EPS)
    y = y * gamma[None, :, None, None] + beta[None, :, None, None]
    # AvgPool3d(2) on 4-D input (1, 3, 2, 2) treated as (C=1, D=3, H=2, W=2).
    return jnp.mean(y[0, 0:2, :, :]).reshape(1, 1, 1, 1)


if __name__ == "__main__":
    key = jax.random.PRNGKey(0)
    kx, kw, kb, kg, kbe = jax.random.split(key, 5)

    # Example input, matching the module's expected shape (1, 3, 4, 4).
    x = jax.random.normal(kx, (1, 3, 4, 4), dtype=jnp.float32)

    # Conv2d(3, 3, 3) default-style init; BN affine params made non-trivial so
    # the check exercises the full scale/shift path.
    fan_in = 3 * 3 * 3
    bound = 1.0 / (fan_in ** 0.5)
    w = jax.random.uniform(kw, (3, 3, 3, 3), jnp.float32, -bound, bound)
    b = jax.random.uniform(kb, (3,), jnp.float32, -bound, bound)
    gamma = jax.random.uniform(kg, (3,), jnp.float32, 0.5, 1.5)
    beta = jax.random.uniform(kbe, (3,), jnp.float32, -0.5, 0.5)

    out = jax.block_until_ready(model_forward(x, w, b, gamma, beta))
    ref = jax.block_until_ready(_reference(x, w, b, gamma, beta))

    assert out.shape == (1, 1, 1, 1)
    assert jnp.allclose(out, ref, atol=1e-5, rtol=1e-4), (out, ref)

    print("KERNEL_OK")
</pallas_src>

<mosaic_0001>
module attributes {stable_mosaic.version = 11 : i64} {
  func.func @_model_kernel(%arg0: memref<8xf32, #tpu.memory_space<smem>>, %arg1: memref<16x27xf32, #tpu.memory_space<vmem>>, %arg2: memref<1x1xf32, #tpu.memory_space<vmem>>) attributes {dimension_semantics = [], scalar_prefetch = 0 : i64, scratch_operands = 0 : i64, tpu.core_type = #tpu.core_type<tc>} {
    %c0 = arith.constant 0 : index
    %c0_0 = arith.constant 0 : index
    %0 = vector.load %arg1[%c0, %c0_0] : memref<16x27xf32, #tpu.memory_space<vmem>>, vector<16x27xf32>
    %1 = vector.extract_strided_slice %0 {offsets = [0, 0], sizes = [8, 27], strides = [1, 1]} : vector<16x27xf32> to vector<8x27xf32>
    %2 = vector.extract_strided_slice %0 {offsets = [8, 0], sizes = [8, 27], strides = [1, 1]} : vector<16x27xf32> to vector<8x27xf32>
    %3 = arith.mulf %1, %2 : vector<8x27xf32>
    %cst = arith.constant dense<0.000000e+00> : vector<8xf32>
    %4 = vector.multi_reduction <add>, %3, %cst [1] : vector<8x27xf32> to vector<8xf32>
    %5 = vector.shape_cast %4 : vector<8xf32> to vector<8x1xf32>
    %6 = vector.extract_strided_slice %5 {offsets = [0, 0], sizes = [4, 1], strides = [1, 1]} : vector<8x1xf32> to vector<4x1xf32>
    %c0_1 = arith.constant 0 : index
    %7 = memref.load %arg0[%c0_1] : memref<8xf32, #tpu.memory_space<smem>>
    %8 = vector.broadcast %7 : f32 to vector<4x1xf32>
    %9 = arith.addf %6, %8 : vector<4x1xf32>
    %cst_2 = arith.constant 0.000000e+00 : f32
    %10 = vector.broadcast %cst_2 : f32 to vector<4x1xf32>
    %11 = arith.maximumf %9, %10 : vector<4x1xf32>
    %12 = vector.shape_cast %11 : vector<4x1xf32> to vector<1x4x1xf32>
    %cst_3 = arith.constant dense<0.000000e+00> : vector<1xf32>
    %13 = vector.multi_reduction <add>, %12, %cst_3 [1, 2] : vector<1x4x1xf32> to vector<1xf32>
    %14 = vector.shape_cast %13 : vector<1xf32> to vector<1x1x1xf32>
    %15 = vector.extract %14[0, 0, 0] : f32 from vector<1x1x1xf32>
    %cst_4 = arith.constant 4.000000e+00 : f32
    %16 = arith.divf %15, %cst_4 : f32
    %17 = vector.broadcast %16 : f32 to vector<4x1xf32>
    %18 = arith.subf %11, %17 : vector<4x1xf32>
    %19 = arith.mulf %18, %18 : vector<4x1xf32>
    %20 = vector.shape_cast %19 : vector<4x1xf32> to vector<1x4x1xf32>
    %cst_5 = arith.constant dense<0.000000e+00> : vector<1xf32>
    %21 = vector.multi_reduction <add>, %20, %cst_5 [1, 2] : vector<1x4x1xf32> to vector<1xf32>
    %22 = vector.shape_cast %21 : vector<1xf32> to vector<1x1x1xf32>
    %23 = vector.extract %22[0, 0, 0] : f32 from vector<1x1x1xf32>
    %cst_6 = arith.constant 4.000000e+00 : f32
    %24 = arith.divf %23, %cst_6 : f32
    %25 = vector.broadcast %16 : f32 to vector<4x1xf32>
    %26 = arith.subf %11, %25 : vector<4x1xf32>
    %cst_7 = arith.constant 9.99999974E-6 : f32
    %27 = arith.addf %24, %cst_7 : f32
    %28 = math.rsqrt %27 : f32
    %29 = vector.broadcast %28 : f32 to vector<4x1xf32>
    %30 = arith.mulf %26, %29 : vector<4x1xf32>
    %c2 = arith.constant 2 : index
    %31 = memref.load %arg0[%c2] : memref<8xf32, #tpu.memory_space<smem>>
    %32 = vector.broadcast %31 : f32 to vector<4x1xf32>
    %33 = arith.mulf %30, %32 : vector<4x1xf32>
    %c4 = arith.constant 4 : index
    %34 = memref.load %arg0[%c4] : memref<8xf32, #tpu.memory_space<smem>>
    %35 = vector.broadcast %34 : f32 to vector<4x1xf32>
    %36 = arith.addf %33, %35 : vector<4x1xf32>
    %37 = vector.shape_cast %36 : vector<4x1xf32> to vector<1x4x1xf32>
    %cst_8 = arith.constant dense<0.000000e+00> : vector<1xf32>
    %38 = vector.multi_reduction <add>, %37, %cst_8 [1, 2] : vector<1x4x1xf32> to vector<1xf32>
    %39 = vector.shape_cast %38 : vector<1xf32> to vector<1x1x1xf32>
    %40 = vector.extract %39[0, 0, 0] : f32 from vector<1x1x1xf32>
    %cst_9 = arith.constant 0.000000e+00 : f32
    %41 = arith.addf %cst_9, %40 : f32
    %42 = vector.extract_strided_slice %5 {offsets = [4, 0], sizes = [4, 1], strides = [1, 1]} : vector<8x1xf32> to vector<4x1xf32>
    %c1 = arith.constant 1 : index
    %43 = memref.load %arg0[%c1] : memref<8xf32, #tpu.memory_space<smem>>
    %44 = vector.broadcast %43 : f32 to vector<4x1xf32>
    %45 = arith.addf %42, %44 : vector<4x1xf32>
    %cst_10 = arith.constant 0.000000e+00 : f32
    %46 = vector.broadcast %cst_10 : f32 to vector<4x1xf32>
    %47 = arith.maximumf %45, %46 : vector<4x1xf32>
    %48 = vector.shape_cast %47 : vector<4x1xf32> to vector<1x4x1xf32>
    %cst_11 = arith.constant dense<0.000000e+00> : vector<1xf32>
    %49 = vector.multi_reduction <add>, %48, %cst_11 [1, 2] : vector<1x4x1xf32> to vector<1xf32>
    %50 = vector.shape_cast %49 : vector<1xf32> to vector<1x1x1xf32>
    %51 = vector.extract %50[0, 0, 0] : f32 from vector<1x1x1xf32>
    %cst_12 = arith.constant 4.000000e+00 : f32
    %52 = arith.divf %51, %cst_12 : f32
    %53 = vector.broadcast %52 : f32 to vector<4x1xf32>
    %54 = arith.subf %47, %53 : vector<4x1xf32>
    %55 = arith.mulf %54, %54 : vector<4x1xf32>
    %56 = vector.shape_cast %55 : vector<4x1xf32> to vector<1x4x1xf32>
    %cst_13 = arith.constant dense<0.000000e+00> : vector<1xf32>
    %57 = vector.multi_reduction <add>, %56, %cst_13 [1, 2] : vector<1x4x1xf32> to vector<1xf32>
    %58 = vector.shape_cast %57 : vector<1xf32> to vector<1x1x1xf32>
    %59 = vector.extract %58[0, 0, 0] : f32 from vector<1x1x1xf32>
    %cst_14 = arith.constant 4.000000e+00 : f32
    %60 = arith.divf %59, %cst_14 : f32
    %61 = vector.broadcast %52 : f32 to vector<4x1xf32>
    %62 = arith.subf %47, %61 : vector<4x1xf32>
    %cst_15 = arith.constant 9.99999974E-6 : f32
    %63 = arith.addf %60, %cst_15 : f32
    %64 = math.rsqrt %63 : f32
    %65 = vector.broadcast %64 : f32 to vector<4x1xf32>
    %66 = arith.mulf %62, %65 : vector<4x1xf32>
    %c3 = arith.constant 3 : index
    %67 = memref.load %arg0[%c3] : memref<8xf32, #tpu.memory_space<smem>>
    %68 = vector.broadcast %67 : f32 to vector<4x1xf32>
    %69 = arith.mulf %66, %68 : vector<4x1xf32>
    %c5 = arith.constant 5 : index
    %70 = memref.load %arg0[%c5] : memref<8xf32, #tpu.memory_space<smem>>
    %71 = vector.broadcast %70 : f32 to vector<4x1xf32>
    %72 = arith.addf %69, %71 : vector<4x1xf32>
    %73 = vector.shape_cast %72 : vector<4x1xf32> to vector<1x4x1xf32>
    %cst_16 = arith.constant dense<0.000000e+00> : vector<1xf32>
    %74 = vector.multi_reduction <add>, %73, %cst_16 [1, 2] : vector<1x4x1xf32> to vector<1xf32>
    %75 = vector.shape_cast %74 : vector<1xf32> to vector<1x1x1xf32>
    %76 = vector.extract %75[0, 0, 0] : f32 from vector<1x1x1xf32>
    %77 = arith.addf %41, %76 : f32
    %cst_17 = arith.constant 1.250000e-01 : f32
    %78 = arith.mulf %77, %cst_17 : f32
    %79 = vector.broadcast %78 : f32 to vector<1x1xf32>
    %c0_18 = arith.constant 0 : index
    %c0_19 = arith.constant 0 : index
    %80 = vector.load %arg2[%c0_18, %c0_19] : memref<1x1xf32, #tpu.memory_space<vmem>>, vector<1x1xf32>
    tpu.vector_store %arg2[%c0_18, %c0_19], %79 {strides = array<i32>} : memref<1x1xf32, #tpu.memory_space<vmem>>, vector<1x1xf32>,
    return
  }
}

</mosaic_0001>

<bundles_post_ra>
// kernel: model_forward.1
= control target key start
LH: loop header
LB: loop body
LE: loop exit
PB: predicated region body
PF: predicated region fallthrough
CT: control target
= control target key end

     0   :  { %7 = vsyncpa [#allocation4], 0  ;;  %s292_s0 = inlined_call_operand.vmem [shape: f32[8], index: 0, kind: input, shape index: {}]   ;;  %s293_s1 = inlined_call_operand.vmem [shape: f32[16,27], index: 1, kind: input, shape index: {}]   ;;  %s294_s2 = inlined_call_operand.hbm [shape: f32[1,1], index: 2, kind: output, shape index: {}]  }
   0x1   :  { %8 = vsyncpa [#allocation3], 0  ;;  %s15_s11 = sshll.u32 %s292_s0, 4  ;;  %s16_s11 = int_to_ptr.vmem [resolvable:$true] %s15_s11 }
   0x2   :  { %s200_s12 = scalar_lea.vmem %s16_s11, 16  ;;  %p205_p1 = scmp.lt.s32.totalorder %s16_s11, %s16_s11 }
   0x3   :  { %p201_p0 = scmp.ne.s32.totalorder %s16_s11, %s200_s12  ;;  %p206_p2 = scmp.lt.s32.totalorder %s200_s12, %s200_s12 }
   0x5   :  { %p207_p3 = por %p206_p2, %p205_p1 }
   0x7   :  { %p208_p4 = pnand %p207_p3, %p201_p0 }
   0x9   :  { %211 = shalt.err (!%p208_p4)
}
   0xa   :  { %s238_s13 = smov [#allocation2]  }
   0xb   :  { %18 = dma.vmem_to_smem %s16_s11, 16, %s238_s13, [#allocation4]  }
   0xc   :  { %234 = dma.done.wait [#allocation4], 16  }
   0xd   :  { %235 = vsyncadd [#allocation4], 4294967280 }
   0xe   :  { %24 = sfence }
   0xf   :  { %v25_v0 = vld [vmem:[%s293_s1] sm:$0xff]  ;;  %v26_v1 = vld [vmem:[%s293_s1 + $0x8] sm:$0xff]  ;;  %vm28_vm0 = vcmask 220160   ;;  %s32_s0 = sld [smem:[#allocation2]]  ;;  %s175_s18 = sld [smem:[#allocation2 + $0x1]]  ;;  %vm36_vm1 = vcmask 3072  }
  0x10   :  { %v27_v2 = vmul.f32 %v26_v1, %v25_v0  ;;  %s173_s23 = sld [smem:[#allocation2 + $0x2]]  ;;  %s174_s24 = sld [smem:[#allocation2 + $0x4]]  ;;  %vm156_vm2 = vcmask 0  }
  0x11   :  { %s176_s4 = sld [smem:[#allocation2 + $0x3]]  ;;  %s177_s5 = sld [smem:[#allocation2 + $0x5]] }
  0x12   :  { %v29_v3 = vsel %vm28_vm0, %v27_v2, 0.0  ;;  %s239_s9 = smov [#allocation5]  }
  0x13   :  { %30 = vadd.xlane.f32.xlu0 %v29_v3  ;;  %s164_s10 = sshll.u32 %s239_s9, 4  ;;  %s165_s10 = int_to_ptr.vmem [resolvable:$true] %s164_s10 }
  0x14   :  { %s212_s12 = scalar_lea.vmem %s165_s10, 16  ;;  %s216_s13 = scalar_lea.vmem %s165_s10, 32 }
  0x15   :  { %v33_v4 = vstv %s32_s0  ;;  %v90_v5 = vstv %s175_s18  ;;  %p213_p5 = scmp.ne.s32.totalorder %s165_s10, %s212_s12  ;;  %p217_p6 = scmp.lt.s32.totalorder %s165_s10, %s165_s10 }
  0x16   :  { %v73_v35 = vstv %s173_s23  ;;  %v76_v37 = vstv %s174_s24  ;;  %p218_p7 = scmp.lt.s32.totalorder %s216_s13, %s212_s12 }
  0x18   :  { %p219_p8 = por %p218_p7, %p217_p6 }
  0x1a   :  { %p220_p9 = pnand %p219_p8, %p213_p5 }
  0xa0   :  { %v31_v6 = vpop.xlane.xlu0 %30 }
  0xa1   :  { %v34_v7 = vadd.f32 %v33_v4, %v31_v6  ;;  %v264_v8 = vadd.f32 %v90_v5, %v31_v6  ;;  %v135_v6 = vstv %s176_s4 }
  0xa3   :  { %v35_v9 = vmax.f32 %v34_v7, 0.0  ;;  %v92_v10 = vmax.f32 %v264_v8, 0.0  ;;  %v138_v8 = vstv %s177_s5 }
  0xa5   :  { %v37_v11 = vsel %vm36_vm1, %v35_v9, 0.0  ;;  %v94_v12 = vrot.slane %v92_v10, 4 }
  0xa6   :  { %38 = vadd.xlane.f32.xlu0 %v37_v11 }
  0xa7   :  { %v96_v13 = vsel %vm36_vm1, %v94_v12, 0.0 }
  0xaa   :  { %97 = vadd.xlane.f32.xlu0 %v96_v13 }
 0x133   :  { %v39_v14 = vpop.xlane.xlu0 %38 }
 0x134   :  { %v40_v15 = vrot.slane %v39_v14, 4 }
 0x136   :  { %v41_v16 = vadd.f32 %v40_v15, %v39_v14 }
 0x137   :  { %v98_v41 = vpop.xlane.xlu0 %97 }
 0x138   :  { %v42_v17 = vrot.slane %v41_v16, 2  ;;  %v99_v42 = vrot.slane %v98_v41, 4 }
 0x13a   :  { %v43_v18 = vadd.f32 %v42_v17, %v41_v16  ;;  %v100_v43 = vadd.f32 %v99_v42, %v98_v41 }
 0x13c   :  { %v44_v19 = vrot.slane %v43_v18, 1  ;;  %v101_v44 = vrot.slane %v100_v43, 2 }
 0x13e   :  { %v45_v20 = vadd.f32 %v44_v19, %v43_v18  ;;  %v102_v48 = vadd.f32 %v101_v44, %v100_v43 }
 0x140   :  { %178 = vpush %v45_v20  ;;  %v103_v51 = vrot.slane %v102_v48, 1 }
 0x142   :  { %v104_v54 = vadd.f32 %v103_v51, %v102_v48 }
 0x171   :  { %s179_s1 = spop %178 }
 0x172   :  { %s49_s19 = smul.f32 0.25, %s179_s1 }
 0x174   :  { %v50_v21 = vstv %s49_s19 }
 0x175   :  { %v51_v22 = vsub.f32 %v35_v9, %v50_v21 }
 0x177   :  { %v52_v23 = vmul.f32 %v51_v22, %v51_v22 }
 0x179   :  { %v53_v24 = vsel %vm36_vm1, %v52_v23, 0.0 }
 0x17a   :  { %54 = vadd.xlane.f32.xlu1 %v53_v24 }
 0x207   :  { %v55_v25 = vpop.xlane.xlu1 %54 }
 0x208   :  { %v56_v26 = vrot.slane %v55_v25, 4 }
 0x20a   :  { %v57_v27 = vadd.f32 %v56_v26, %v55_v25 }
 0x20c   :  { %v58_v28 = vrot.slane %v57_v27, 2 }
 0x20e   :  { %v59_v29 = vadd.f32 %v58_v28, %v57_v27 }
 0x210   :  { %v60_v30 = vrot.slane %v59_v29, 1 }
 0x212   :  { %v61_v31 = vadd.f32 %v60_v30, %v59_v29 }
 0x214   :  { %180 = vpush %v61_v31 }
 0x245   :  { %s181_s20 = spop %180 }
 0x246   :  { %s65_s21 = smul.f32 0.25, %s181_s20 }
 0x248   :  { %s66_s22 = sadd.f32 1e-05, %s65_s21 }
 0x24a   :  { %v67_v32 = vstv %s66_s22 }
 0x24b   :  { %196 = vrsqrt.f32 %v67_v32 }
 0x255   :  { %v197_v33 = vpop.eup %196 }
 0x256   :  { %182 = vpush %v197_v33 }
 0x287   :  { %s183_s25 = spop %182 }
 0x288   :  { %v70_v34 = vstv %s183_s25 }
 0x289   :  { %v71_v36 = vmul.f32 %v70_v34, %v51_v22 }
 0x28b   :  { %v74_v38 = vmul.f32 %v73_v35, %v71_v36 }
 0x28d   :  { %v77_v39 = vadd.f32 %v76_v37, %v74_v38 }
 0x28f   :  { %v78_v40 = vsel %vm36_vm1, %v77_v39, 0.0 }
 0x290   :  { %79 = vadd.xlane.f32.xlu1 %v78_v40 }
 0x31d   :  { %v80_v45 = vpop.xlane.xlu1 %79 }
 0x31e   :  { %v81_v46 = vrot.slane %v80_v45, 4 }
 0x320   :  { %v82_v47 = vadd.f32 %v81_v46, %v80_v45 }
 0x322   :  { %v83_v49 = vrot.slane %v82_v47, 2 }
 0x324   :  { %v84_v50 = vadd.f32 %v83_v49, %v82_v47 }
 0x326   :  { %v85_v52 = vrot.slane %v84_v50, 1 }
 0x328   :  { %v86_v53 = vadd.f32 %v85_v52, %v84_v50 }
 0x32a   :  { %184 = vpush %v86_v53 }
 0x32b   :  { %186 = vpush %v104_v54 }
 0x35b   :  { %s273_s26 = spop %184 }
 0x35c   :  { %s187_s27 = spop %186 }
 0x35d   :  { %s108_s28 = smul.f32 0.25, %s187_s27 }
 0x35f   :  { %v109_v55 = vstv %s108_s28 }
 0x360   :  { %v110_v56 = vsub.f32 %v92_v10, %v109_v55 }
 0x362   :  { %v111_v57 = vmul.f32 %v110_v56, %v110_v56 }
 0x364   :  { %v113_v58 = vrot.slane %v111_v57, 4 }
 0x366   :  { %v115_v59 = vsel %vm36_vm1, %v113_v58, 0.0 }
 0x367   :  { %116 = vadd.xlane.f32.xlu1 %v115_v59 }
 0x3f4   :  { %v117_v60 = vpop.xlane.xlu1 %116 }
 0x3f5   :  { %v118_v61 = vrot.slane %v117_v60, 4 }
 0x3f7   :  { %v119_v62 = vadd.f32 %v118_v61, %v117_v60 }
 0x3f9   :  { %v120_v63 = vrot.slane %v119_v62, 2 }
 0x3fb   :  { %v121_v0 = vadd.f32 %v120_v63, %v119_v62 }
 0x3fd   :  { %v122_v1 = vrot.slane %v121_v0, 1 }
 0x3ff   :  { %v123_v2 = vadd.f32 %v122_v1, %v121_v0 }
 0x401   :  { %188 = vpush %v123_v2 }
 0x432   :  { %s189_s29 = spop %188 }
 0x433   :  { %s127_s30 = smul.f32 0.25, %s189_s29 }
 0x435   :  { %s128_s3 = sadd.f32 1e-05, %s127_s30 }
 0x437   :  { %v129_v3 = vstv %s128_s3 }
 0x438   :  { %198 = vrsqrt.f32 %v129_v3 }
 0x442   :  { %v199_v4 = vpop.eup %198 }
 0x443   :  { %190 = vpush %v199_v4 }
 0x474   :  { %s191_s6 = spop %190 }
 0x475   :  { %v132_v5 = vstv %s191_s6 }
 0x476   :  { %v133_v7 = vmul.f32 %v132_v5, %v110_v56 }
 0x478   :  { %v136_v9 = vmul.f32 %v135_v6, %v133_v7 }
 0x47a   :  { %v139_v10 = vadd.f32 %v138_v8, %v136_v9 }
 0x47c   :  { %v141_v11 = vrot.slane %v139_v10, 4 }
 0x47e   :  { %v143_v12 = vsel %vm36_vm1, %v141_v11, 0.0 }
 0x47f   :  { %144 = vadd.xlane.f32.xlu0 %v143_v12 }
 0x50c   :  { %v145_v13 = vpop.xlane.xlu0 %144 }
 0x50d   :  { %v146_v14 = vrot.slane %v145_v13, 4 }
 0x50f   :  { %v147_v15 = vadd.f32 %v146_v14, %v145_v13 }
 0x511   :  { %v148_v16 = vrot.slane %v147_v15, 2 }
 0x513   :  { %v149_v17 = vadd.f32 %v148_v16, %v147_v15 }
 0x515   :  { %v150_v18 = vrot.slane %v149_v17, 1 }
 0x517   :  { %v151_v19 = vadd.f32 %v150_v18, %v149_v17 }
 0x519   :  { %192 = vpush %v151_v19 }
 0x54a   :  { %s193_s7 = spop %192 }
 0x54b   :  { %s153_s8 = sadd.f32 %s193_s7, %s273_s26 }
 0x54d   :  { %s154_s11 = smul.f32 0.125, %s153_s8 }
 0x54f   :  { %v155_v20 = vstv %s154_s11 }
 0x550   :  { %157 = vst.msk [vmem:[#allocation5] sm:$0x1] %vm156_vm2, %v155_v20 }
 0x551   :  { %223 = shalt.err (!%p220_p9)
}
 0x552   :  { %s224_s16 = scalar_lea.hbm %s294_s2, 16 }
 0x553   :  { %p225_p10 = scmp.ne.s32.totalorder %s294_s2, %s224_s16  ;;  %p228_p11 = scmp.lt.u32.totalorder %s224_s16, %s294_s2 }
 0x555   :  { %p230_p12 = pnand %p228_p11, %p225_p10 }
 0x557   :  { %233 = shalt.err (!%p230_p12)
}
 0x558   :  { %167 = dma.vmem_to_hbm [thread:$0]  %s165_s10, 16, %s294_s2, [#allocation3]  }
 0x559   :  { %236 = dma.done.wait [#allocation3], 16  }
 0x55a   :  { %237 = vsyncadd [#allocation3], 4294967280 }
 0x55b   :  { %171 = vsyncpa [#allocation3], 1 }
 0x55c   :  { %172 = vsyncpa [#allocation4], 1 }

</bundles_post_ra>
